<compile_context>
chip_gen: v7x
topology: tpu7x:2x2x1
jax: 0.10.0
libtpu: 0.0.40
codegen_flags: <defaults>
</compile_context>

<pallas_src>
import functools

import jax
import jax.numpy as jnp
from jax.experimental import pallas as pl
from jax.experimental.pallas import tpu as pltpu

LANES = 128


def _relu_stats_kernel(x_ref, act_ref, psum_ref, *, tile_rows, rem):
    x = x_ref[...]
    # Elementwise ReLU on the VPU, in the input dtype.  Out-of-bounds rows of
    # a ragged last block are dropped by Pallas at writeback.
    act_ref[...] = jnp.maximum(x, jnp.zeros_like(x))

    # Per-(sublane, lane) |x| partial sum, widened to f32.
    ax = jnp.abs(x).astype(jnp.float32)
    groups = tile_rows // 8  # tile_rows is always a multiple of 8

    def write_psum(a):
        # (tile_rows, 128) -> (groups, 8, 128) is a layout no-op; the sum over
        # the leading axis is pure VALU adds across vregs (no XLU reduce).
        psum_ref[...] = a.reshape(groups, 8, LANES).sum(axis=0).reshape(1, 8, LANES)

    if rem:
        # Only the last block is ragged; gate the mask so full blocks pay
        # zero extra VALU work.
        is_last = pl.program_id(0) == pl.num_programs(0) - 1

        @pl.when(is_last)
        def _():
            row_ids = jax.lax.broadcasted_iota(jnp.int32, (tile_rows, LANES), 0)
            write_psum(jnp.where(row_ids < rem, ax, 0.0))

        @pl.when(jnp.logical_not(is_last))
        def _():
            write_psum(ax)
    else:
        write_psum(ax)


@functools.partial(jax.jit, static_argnums=(1,))
def _relu_with_stats_impl(preact, tile_bytes):
    orig_shape = preact.shape
    orig_dtype = preact.dtype
    n = preact.size  # static

    # Sublane packing for the dtype: 8 (f32), 16 (bf16/f16), 32 (int8/fp8).
    itemsize = jnp.dtype(orig_dtype).itemsize
    sub = max(8, 32 // itemsize)

    n_tail = n % LANES            # ragged tail handled outside the kernel
    n_prefix = n - n_tail

    flat = preact.reshape(-1)

    def abs_f32(v):
        return jnp.abs(v.astype(jnp.float32))

    if n_prefix == 0:
        # Whole tensor is smaller than one 128-lane row: no kernel needed.
        act = jnp.maximum(preact, jnp.zeros_like(preact))
        avg_abs = jnp.sum(abs_f32(flat)) / jnp.float32(n)
        return act, avg_abs

    rows = n_prefix // LANES
    x2d = flat[:n_prefix].reshape(rows, LANES)

    # Block sizing by bytes (~tile_bytes per input block), rounded to the
    # dtype's sublane packing and clamped to the array extent.
    tile_rows = max(sub, (tile_bytes // (LANES * itemsize)) // sub * sub)
    tile_rows = min(tile_rows, pl.cdiv(rows, sub) * sub)
    num_blocks = pl.cdiv(rows, tile_rows)
    rem = rows % tile_rows  # static; nonzero -> ragged last block

    kernel = functools.partial(_relu_stats_kernel, tile_rows=tile_rows, rem=rem)

    act2d, psums = pl.pallas_call(
        kernel,
        out_shape=(
            jax.ShapeDtypeStruct((rows, LANES), orig_dtype),
            jax.ShapeDtypeStruct((num_blocks, 8, LANES), jnp.float32),
        ),
        grid_spec=pltpu.PrefetchScalarGridSpec(
            num_scalar_prefetch=0,
            grid=(num_blocks,),
            in_specs=[pl.BlockSpec((tile_rows, LANES), lambda i: (i, 0))],
            out_specs=(
                pl.BlockSpec((tile_rows, LANES), lambda i: (i, 0)),
                pl.BlockSpec((1, 8, LANES), lambda i: (i, 0, 0)),
            ),
        ),
        compiler_params=pltpu.CompilerParams(
            # No cross-step state -> fully parallel grid.
            dimension_semantics=("parallel",),
        ),
    )(x2d)

    abs_sum = jnp.sum(psums)

    if n_tail:
        tail = flat[n_prefix:]
        act_tail = jnp.maximum(tail, jnp.zeros_like(tail))
        act = jnp.concatenate([act2d.reshape(-1), act_tail]).reshape(orig_shape)
        abs_sum = abs_sum + jnp.sum(abs_f32(tail))
    else:
        act = act2d.reshape(orig_shape)

    avg_abs = abs_sum / jnp.float32(n)
    return act, avg_abs


def relu_with_stats(preact, *, tile_bytes=1 << 20):
    """Returns (act, avg_abs): act == relu(preact) (same shape/dtype),
    avg_abs == mean(|preact|) as an f32 scalar."""
    return _relu_with_stats_impl(preact, int(tile_bytes))


class ReluWithStats:
    """Mirror of the PyTorch module: collects mean(|preact|) per forward call."""

    def __init__(self):
        self.collect_preact = True
        self.avg_preacts = []

    def __call__(self, preact):
        act, avg_abs = relu_with_stats(preact)
        if self.collect_preact:
            self.avg_preacts.append(float(jax.device_get(avg_abs)))
        return act


if __name__ == "__main__":
    key = jax.random.PRNGKey(0)
    k1, k2, k3, k4 = jax.random.split(key, 4)

    # 1) Primary NCHW input (128-aligned: copy-free reshape path, single block).
    x1 = jax.random.normal(k1, (2, 4, 16, 16), dtype=jnp.float32)
    module = ReluWithStats()
    act1 = jax.block_until_ready(module(x1))
    assert act1.shape == x1.shape and act1.dtype == x1.dtype
    assert jnp.allclose(act1, jnp.maximum(x1, 0.0))
    assert abs(module.avg_preacts[0] - float(jnp.mean(jnp.abs(x1)))) < 1e-5

    # 2) Ragged numel (prefix kernel + jnp tail) with a small tile to also
    #    exercise multi-block + masked ragged last block (56 rows, 16-row tile).
    x2 = jax.random.normal(k2, (2, 4, 30, 30), dtype=jnp.float32)
    act2, avg2 = relu_with_stats(x2, tile_bytes=16 * LANES * 4)
    act2 = jax.block_until_ready(act2)
    assert act2.shape == x2.shape and act2.dtype == x2.dtype
    assert jnp.allclose(act2, jnp.maximum(x2, 0.0))
    assert abs(float(avg2) - float(jnp.mean(jnp.abs(x2)))) < 1e-5

    # 3) bf16: ReLU stays bf16, |x| sums accumulated in f32; bytes-based tile.
    x3 = jax.random.normal(k3, (2, 4, 16, 16), dtype=jnp.bfloat16)
    act3, avg3 = relu_with_stats(x3)
    act3 = jax.block_until_ready(act3)
    assert act3.shape == x3.shape and act3.dtype == jnp.bfloat16
    assert jnp.array_equal(act3, jnp.maximum(x3, 0))
    assert abs(float(avg3) - float(jnp.mean(jnp.abs(x3.astype(jnp.float32))))) < 1e-4

    # 4) rows % tile_rows != 0 with multiple blocks and rows not a multiple of
    #    the tile (21 rows, 8-row tile -> 3 blocks, last block has 5 valid rows).
    x4 = jax.random.normal(k4, (3, 7, 128), dtype=jnp.float32)
    act4, avg4 = relu_with_stats(x4, tile_bytes=8 * LANES * 4)
    act4 = jax.block_until_ready(act4)
    assert act4.shape == x4.shape and act4.dtype == x4.dtype
    assert jnp.allclose(act4, jnp.maximum(x4, 0.0))
    assert abs(float(avg4) - float(jnp.mean(jnp.abs(x4)))) < 1e-5

    print("KERNEL_OK")
</pallas_src>

<mosaic_0001>
module attributes {stable_mosaic.version = 11 : i64} {
  func.func @_relu_stats_kernel(%arg0: i32, %arg1: memref<16x128xf32, #tpu.memory_space<vmem>>, %arg2: memref<16x128xf32, #tpu.memory_space<vmem>>, %arg3: memref<1x8x128xf32, #tpu.memory_space<vmem>>) attributes {dimension_semantics = [#tpu.dimension_semantics<parallel>], iteration_bounds = array<i64: 1>, scalar_prefetch = 0 : i64, scratch_operands = 0 : i64, tpu.core_type = #tpu.core_type<tc>, window_params = [{transform_indices = @transform_0, window_bounds = array<i64: 16, 128>}, {transform_indices = @transform_1, window_bounds = array<i64: 16, 128>}, {transform_indices = @transform_2, window_bounds = array<i64: 1, 8, 128>}]} {
    %c0 = arith.constant 0 : index
    %c0_0 = arith.constant 0 : index
    %0 = vector.load %arg1[%c0, %c0_0] : memref<16x128xf32, #tpu.memory_space<vmem>>, vector<16x128xf32>
    %cst = arith.constant 0.000000e+00 : f32
    %1 = vector.broadcast %cst : f32 to vector<16x128xf32>
    %2 = arith.maximumf %0, %1 : vector<16x128xf32>
    %c0_1 = arith.constant 0 : index
    %c0_2 = arith.constant 0 : index
    %3 = vector.load %arg2[%c0_1, %c0_2] : memref<16x128xf32, #tpu.memory_space<vmem>>, vector<16x128xf32>
    tpu.vector_store %arg2[%c0_1, %c0_2], %2 {strides = array<i32>} : memref<16x128xf32, #tpu.memory_space<vmem>>, vector<16x128xf32>,
    %4 = math.absf %0 : vector<16x128xf32>
    %5 = vector.shape_cast %4 : vector<16x128xf32> to vector<2x8x128xf32>
    %cst_3 = arith.constant dense<0.000000e+00> : vector<8x128xf32>
    %6 = vector.multi_reduction <add>, %5, %cst_3 [0] : vector<2x8x128xf32> to vector<8x128xf32>
    %7 = vector.shape_cast %6 : vector<8x128xf32> to vector<1x8x128xf32>
    %c0_4 = arith.constant 0 : index
    %c0_5 = arith.constant 0 : index
    %c0_6 = arith.constant 0 : index
    %8 = vector.load %arg3[%c0_4, %c0_5, %c0_6] : memref<1x8x128xf32, #tpu.memory_space<vmem>>, vector<1x8x128xf32>
    tpu.vector_store %arg3[%c0_4, %c0_5, %c0_6], %7 {strides = array<i32>} : memref<1x8x128xf32, #tpu.memory_space<vmem>>, vector<1x8x128xf32>,
    return
  }
  func.func @transform_0(%arg0: i32) -> (i32, i32) {
    %c0_i32 = arith.constant 0 : i32
    %c0_i32_0 = arith.constant 0 : i32
    return %arg0, %c0_i32 : i32, i32
  }
  func.func @transform_1(%arg0: i32) -> (i32, i32) {
    %c0_i32 = arith.constant 0 : i32
    %c0_i32_0 = arith.constant 0 : i32
    return %arg0, %c0_i32 : i32, i32
  }
  func.func @transform_2(%arg0: i32) -> (i32, i32, i32) {
    %c0_i32 = arith.constant 0 : i32
    %c0_i32_0 = arith.constant 0 : i32
    %c0_i32_1 = arith.constant 0 : i32
    return %arg0, %c0_i32, %c0_i32_0 : i32, i32, i32
  }
}

</mosaic_0001>

<bundles_post_ra>
// kernel: _relu_with_stats_impl.1
= control target key start
LH: loop header
LB: loop body
LE: loop exit
PB: predicated region body
PF: predicated region fallthrough
CT: control target
= control target key end

     0   :  { %s58_s0 = inlined_call_operand.vmem [shape: f32[16,128], index: 0, kind: input, shape index: {}]   ;;  %s59_s1 = inlined_call_operand.vmem [shape: f32[16,128], index: 1, kind: output, shape index: {0}]   ;;  %s60_s2 = inlined_call_operand.vmem [shape: f32[1,8,128], index: 2, kind: output, shape index: {1}]  }
   0x1   :  { %v10_v0 = vld [vmem:[%s58_s0] sm:$0xff]  ;;  %v11_v1 = vld [vmem:[%s58_s0 + $0x8] sm:$0xff] }
   0x2   :  { %v12_v2 = vmax.f32 %v10_v0, 0.0  ;;  %v13_v3 = vmax.f32 %v11_v1, 0.0  ;;  %v16_v4 = vand.u32 2147483647, %v10_v0  ;;  %v17_v5 = vand.u32 2147483647, %v11_v1 }
   0x4   :  { %14 = vst [vmem:[%s59_s1] sm:$0xff] %v12_v2  ;;  %15 = vst [vmem:[%s59_s1 + $0x8] sm:$0xff] %v13_v3  ;;  %v18_v6 = vadd.f32 %v17_v5, %v16_v4 }
   0x6   :  { %19 = vst [vmem:[%s60_s2] sm:$0xff] %v18_v6 }

</bundles_post_ra>
